<compile_context>
chip_gen: v7x
topology: tpu7x:2x2x1
jax: 0.10.0
libtpu: 0.0.40
codegen_flags: <defaults>
</compile_context>

<pallas_src>
import functools

import numpy as np
import jax
import jax.numpy as jnp
from jax.experimental import pallas as pl
from jax.experimental.pallas import tpu as pltpu

# ----------------------------------------------------------------------------
# Config (stand-in for cfg['defaults'] in the original script; deterministic).
# ----------------------------------------------------------------------------
cfg = {
    "defaults": {
        "spectrogram": {
            "fmax": 8000.0,
            "fmin": 0.0,
            "hop_length": 64,
            "n_fft": 256,
            "n_mels": 128,
        },
        "audio": {"target_sampling_rate": 16000},
    }
}
spec_cfg = cfg["defaults"]["spectrogram"]
FMAX = spec_cfg["fmax"]
FMIN = spec_cfg["fmin"]
HOP_LENGTH = spec_cfg["hop_length"]
N_FFT = spec_cfg["n_fft"]
N_MELS = spec_cfg["n_mels"]
SAMPLE_RATE = cfg["defaults"]["audio"]["target_sampling_rate"]

N_FREQS = N_FFT // 2 + 1
AMIN = 1e-10

MAX_TM = 512                  # frames per grid step (perf review: 512-1024; 512 balances
                              # step-overhead amortization vs padded-frame waste)
TAIL = 128                    # extra hop-columns fetched per step (min lane-aligned block)
R = N_FFT // HOP_LENGTH       # hop blocks per frame (= 4 for this config)
OUT_DTYPE = jnp.float32       # flip to jnp.bfloat16 to halve output DMA (gate on tolerance)

assert N_FFT % HOP_LENGTH == 0, "in-kernel framing assumes n_fft % hop == 0"
assert HOP_LENGTH % 8 == 0, "hop-major sublane dim must be a multiple of 8"
assert R <= TAIL, "tail block must cover the frame overlap"
assert MAX_TM % TAIL == 0
assert N_MELS % 8 == 0


# ----------------------------------------------------------------------------
# Deterministic parameter construction (matches torchaudio defaults).
# ----------------------------------------------------------------------------
def _hz_to_mel_htk(f):
    return 2595.0 * np.log10(1.0 + np.asarray(f, dtype=np.float64) / 700.0)


def _mel_to_hz_htk(m):
    return 700.0 * (10.0 ** (np.asarray(m, dtype=np.float64) / 2595.0) - 1.0)


def make_mel_filterbank():
    """torchaudio.functional.melscale_fbanks(norm=None, mel_scale='htk')."""
    all_freqs = np.linspace(0.0, SAMPLE_RATE // 2, N_FREQS)
    m_min = _hz_to_mel_htk(FMIN)
    m_max = _hz_to_mel_htk(FMAX)
    m_pts = np.linspace(m_min, m_max, N_MELS + 2)
    f_pts = _mel_to_hz_htk(m_pts)
    f_diff = f_pts[1:] - f_pts[:-1]                      # [n_mels+1]
    slopes = f_pts[None, :] - all_freqs[:, None]         # [n_freqs, n_mels+2]
    down_slopes = -slopes[:, :-2] / f_diff[:-1]
    up_slopes = slopes[:, 2:] / f_diff[1:]
    fb = np.maximum(0.0, np.minimum(down_slopes, up_slopes))  # [n_freqs, n_mels]
    return fb.astype(np.float32)


def _build_constants():
    """Window-folded transposed DFT basis and transposed mel filterbank (f32 numpy)."""
    fb = make_mel_filterbank()                            # [N_FREQS, N_MELS]
    # Truncate bins that carry no mel weight. Valid (exact up to ~1e-14) when
    # fmax == sr/2, which zeroes the Nyquist bin weight; otherwise pad the full
    # onesided set up to a lane multiple.
    if N_FREQS > 128 and float(np.abs(fb[128:]).max()) <= 1e-6:
        nb = 128
    else:
        nb = ((N_FREQS + 127) // 128) * 128
    fb_nb = np.zeros((nb, N_MELS), dtype=np.float32)
    k = min(nb, N_FREQS)
    fb_nb[:k] = fb[:k]
    fb_t = np.ascontiguousarray(fb_nb.T)                  # [N_MELS, nb]

    n = np.arange(N_FFT, dtype=np.float64)
    window = 0.5 * (1.0 - np.cos(2.0 * np.pi * n / N_FFT))  # periodic hann
    kk = np.arange(nb, dtype=np.float64)
    ang = 2.0 * np.pi * n[:, None] * kk[None, :] / N_FFT    # [N_FFT, nb]
    dftw = window[:, None] * np.concatenate([np.cos(ang), np.sin(ang)], axis=1)
    dftw_t = np.ascontiguousarray(dftw.T).astype(np.float32)  # [2*nb, N_FFT]
    return dftw_t, fb_t, nb


DFTW_T, FB_T, NB = _build_constants()


def _choose_tm(n_frames: int) -> int:
    """Largest useful frame-tile: amortize step overhead, avoid padding waste."""
    tm = ((n_frames + 127) // 128) * 128
    return int(max(128, min(MAX_TM, tm)))


# ----------------------------------------------------------------------------
# Pallas kernel: hop-major waveform columns -> frames -> power -> mel -> dB.
# ----------------------------------------------------------------------------
def melspec_kernel(wmain_ref, wtail_ref, dftw_ref, fb_ref, out_ref, *, tm):
    # Hop-major waveform columns for this tile of `tm` frames: [HOP, tm + TAIL], bf16.
    cols = jnp.concatenate([wmain_ref[0], wtail_ref[0]], axis=1)
    # Assemble transposed, window-unscaled frames (bf16):
    #   frT[j*HOP + h, t] = padded[(tile_start + t + j)*HOP + h]
    frT = jnp.concatenate([cols[:, j:j + tm] for j in range(R)], axis=0)  # [N_FFT, tm]
    # Single MXU matmul against the window-folded cos|sin basis (bf16 x bf16 -> f32 acc).
    reim = jnp.dot(dftw_ref[...], frT, preferred_element_type=jnp.float32)  # [2*NB, tm]
    re = reim[:NB, :]
    im = reim[NB:, :]
    power = (re * re + im * im).astype(jnp.bfloat16)                        # [NB, tm]
    mel = jnp.dot(fb_ref[...], power, preferred_element_type=jnp.float32)   # [N_MELS, tm]
    mel = jnp.maximum(mel, AMIN)
    # AmplitudeToDB(power): 10*log10(x) - 10*log10(max(amin, ref=1.0)); 2nd term == 0.
    out_ref[0] = ((10.0 / np.log(10.0)) * jnp.log(mel)).astype(out_ref.dtype)


def _pallas_melspec(wave_t, n_tiles, tm):
    """wave_t: [B, HOP, n_hop_cols] hop-major padded waveform (bf16)."""
    B = wave_t.shape[0]
    n_frames_pad = n_tiles * tm
    rows = B * n_frames_pad
    out_bytes = int(jnp.dtype(OUT_DTYPE).itemsize)
    cost = pl.CostEstimate(
        flops=2 * rows * N_FFT * (2 * NB) + 2 * rows * NB * N_MELS + 3 * rows * NB,
        transcendentals=rows * N_MELS,
        bytes_accessed=(wave_t.size + B * n_tiles * HOP_LENGTH * TAIL) * 2
        + (DFTW_T.size + FB_T.size) * 2
        + rows * N_MELS * out_bytes,
    )
    dftw = jnp.asarray(DFTW_T, dtype=jnp.bfloat16)
    fb = jnp.asarray(FB_T, dtype=jnp.bfloat16)
    return pl.pallas_call(
        functools.partial(melspec_kernel, tm=tm),
        out_shape=jax.ShapeDtypeStruct((B, N_MELS, n_frames_pad), OUT_DTYPE),
        grid=(B, n_tiles),
        in_specs=[
            # main `tm` hop-columns of this tile
            pl.BlockSpec((1, HOP_LENGTH, tm), lambda b, i: (b, 0, i)),
            # next TAIL hop-columns (frame overlap into the following tile)
            pl.BlockSpec((1, HOP_LENGTH, TAIL),
                         lambda b, i: (b, 0, (i + 1) * (tm // TAIL))),
            # constants: resident across the whole grid
            pl.BlockSpec((2 * NB, N_FFT), lambda b, i: (0, 0)),
            pl.BlockSpec((N_MELS, NB), lambda b, i: (0, 0)),
        ],
        out_specs=pl.BlockSpec((1, N_MELS, tm), lambda b, i: (b, 0, i)),
        compiler_params=pltpu.CompilerParams(
            dimension_semantics=("parallel", "parallel")),
        cost_estimate=cost,
    )(wave_t, wave_t, dftw, fb)


# ----------------------------------------------------------------------------
# Wrapper: bf16 cast + fused (reflect|zero) pad + hop-major relayout + slice.
# ----------------------------------------------------------------------------
def mel_spec_gpu(waveform):
    """waveform: [B, T] -> log-mel [B, N_MELS, frames] (OUT_DTYPE)."""
    # Explicit bf16: matches default-precision MXU truncation, halves DMA/VMEM.
    waveform = waveform.astype(jnp.bfloat16)
    B, T = waveform.shape
    pad = N_FFT // 2
    assert T >= pad + 1, "reflect padding requires T >= n_fft//2 + 1"

    n_frames = 1 + T // HOP_LENGTH
    tm = _choose_tm(n_frames)
    n_tiles = -(-n_frames // tm)

    # Enough hop-columns so every tile (plus its TAIL overlap) is in-bounds.
    n_hops = n_tiles * tm + TAIL
    total = n_hops * HOP_LENGTH

    # Fused reflect pad (STFT center=True) + trailing zero pad, single pass.
    left = waveform[:, 1:pad + 1][:, ::-1]
    right = waveform[:, -pad - 1:-1][:, ::-1]
    zeros = jnp.zeros((B, total - (T + 2 * pad)), dtype=waveform.dtype)
    padded = jnp.concatenate([left, waveform, right, zeros], axis=1)  # [B, total]

    # Hop-major layout: wave_t[b, h, m] = padded[b, m*HOP + h]  (bf16 relayout)
    wave_t = padded.reshape(B, n_hops, HOP_LENGTH).transpose(0, 2, 1)

    out = _pallas_melspec(wave_t, n_tiles, tm)       # [B, N_MELS, n_tiles*tm]
    return out[:, :, :n_frames]                      # [B, N_MELS, frames]


if __name__ == "__main__":
    key = jax.random.PRNGKey(0)
    B, T = 2, 512                    # small: frames = 1 + T // HOP_LENGTH = 9
    waveform = jax.random.normal(key, (B, T), dtype=jnp.float32)

    mel_spec = jax.jit(mel_spec_gpu)
    log_mel = mel_spec(waveform)
    jax.block_until_ready(log_mel)

    assert log_mel.shape == (B, N_MELS, 1 + T // HOP_LENGTH), log_mel.shape
    assert log_mel.dtype == OUT_DTYPE
    assert bool(jnp.all(jnp.isfinite(log_mel)))
    print("KERNEL_OK")
</pallas_src>

<mosaic_0001>
module attributes {stable_mosaic.version = 11 : i64} {
  func.func @melspec_kernel(%arg0: i32, %arg1: i32, %arg2: memref<1x64x128xbf16, #tpu.memory_space<vmem>>, %arg3: memref<1x64x128xbf16, #tpu.memory_space<vmem>>, %arg4: memref<256x256xbf16, #tpu.memory_space<vmem>>, %arg5: memref<128x128xbf16, #tpu.memory_space<vmem>>, %arg6: memref<1x128x128xf32, #tpu.memory_space<vmem>>) attributes {dimension_semantics = [#tpu.dimension_semantics<parallel>, #tpu.dimension_semantics<parallel>], iteration_bounds = array<i64: 2, 1>, scalar_prefetch = 0 : i64, scratch_operands = 0 : i64, tpu.core_type = #tpu.core_type<tc>, window_params = [{transform_indices = @transform_0, window_bounds = array<i64: 1, 64, 128>}, {transform_indices = @transform_1, window_bounds = array<i64: 1, 64, 128>}, {pipeline_mode = #tpu.pipeline_mode<synchronous>, transform_indices = @transform_2, window_bounds = array<i64: 256, 256>}, {pipeline_mode = #tpu.pipeline_mode<synchronous>, transform_indices = @transform_3, window_bounds = array<i64: 128, 128>}, {transform_indices = @transform_4, window_bounds = array<i64: 1, 128, 128>}]} {
    %c0 = arith.constant 0 : index
    %c0_0 = arith.constant 0 : index
    %c0_1 = arith.constant 0 : index
    %0 = vector.load %arg2[%c0, %c0_0, %c0_1] : memref<1x64x128xbf16, #tpu.memory_space<vmem>>, vector<1x64x128xbf16>
    %1 = vector.shape_cast %0 : vector<1x64x128xbf16> to vector<64x128xbf16>
    %c0_2 = arith.constant 0 : index
    %c0_3 = arith.constant 0 : index
    %c0_4 = arith.constant 0 : index
    %2 = vector.load %arg3[%c0_2, %c0_3, %c0_4] : memref<1x64x128xbf16, #tpu.memory_space<vmem>>, vector<1x64x128xbf16>
    %3 = vector.shape_cast %2 : vector<1x64x128xbf16> to vector<64x128xbf16>
    %4 = tpu.concatenate %1, %3 in 1 : vector<64x128xbf16>, vector<64x128xbf16> -> vector<64x256xbf16>
    %5 = vector.extract_strided_slice %4 {offsets = [0, 0], sizes = [64, 128], strides = [1, 1]} : vector<64x256xbf16> to vector<64x128xbf16>
    %6 = vector.extract_strided_slice %4 {offsets = [0, 1], sizes = [64, 128], strides = [1, 1]} : vector<64x256xbf16> to vector<64x128xbf16>
    %7 = vector.extract_strided_slice %4 {offsets = [0, 2], sizes = [64, 128], strides = [1, 1]} : vector<64x256xbf16> to vector<64x128xbf16>
    %8 = vector.extract_strided_slice %4 {offsets = [0, 3], sizes = [64, 128], strides = [1, 1]} : vector<64x256xbf16> to vector<64x128xbf16>
    %9 = tpu.concatenate %5, %6, %7, %8 in 0 : vector<64x128xbf16>, vector<64x128xbf16>, vector<64x128xbf16>, vector<64x128xbf16> -> vector<256x128xbf16>
    %c0_5 = arith.constant 0 : index
    %c0_6 = arith.constant 0 : index
    %10 = vector.load %arg4[%c0_5, %c0_6] : memref<256x256xbf16, #tpu.memory_space<vmem>>, vector<256x256xbf16>
    %cst = arith.constant dense<0.000000e+00> : vector<256x128xf32>
    %11 = tpu.matmul %10, %9, %cst {dimension_numbers = #tpu.dot_dimension_numbers<[1], [0], [0], [1], [0, 0, 1, 1], [], []>} : vector<256x256xbf16>, vector<256x128xbf16>, vector<256x128xf32> -> vector<256x128xf32>
    %12 = vector.extract_strided_slice %11 {offsets = [0, 0], sizes = [128, 128], strides = [1, 1]} : vector<256x128xf32> to vector<128x128xf32>
    %13 = vector.extract_strided_slice %11 {offsets = [128, 0], sizes = [128, 128], strides = [1, 1]} : vector<256x128xf32> to vector<128x128xf32>
    %14 = arith.mulf %12, %12 : vector<128x128xf32>
    %15 = arith.mulf %13, %13 : vector<128x128xf32>
    %16 = arith.addf %14, %15 : vector<128x128xf32>
    %17 = arith.truncf %16 : vector<128x128xf32> to vector<128x128xbf16>
    %c0_7 = arith.constant 0 : index
    %c0_8 = arith.constant 0 : index
    %18 = vector.load %arg5[%c0_7, %c0_8] : memref<128x128xbf16, #tpu.memory_space<vmem>>, vector<128x128xbf16>
    %cst_9 = arith.constant dense<0.000000e+00> : vector<128x128xf32>
    %19 = tpu.matmul %18, %17, %cst_9 {dimension_numbers = #tpu.dot_dimension_numbers<[1], [0], [0], [1], [0, 0, 1, 1], [], []>} : vector<128x128xbf16>, vector<128x128xbf16>, vector<128x128xf32> -> vector<128x128xf32>
    %cst_10 = arith.constant 1.000000e-10 : f32
    %20 = vector.broadcast %cst_10 : f32 to vector<128x128xf32>
    %21 = arith.maximumf %19, %20 : vector<128x128xf32>
    %22 = math.log %21 : vector<128x128xf32>
    %cst_11 = arith.constant 4.34294462 : f32
    %23 = vector.broadcast %cst_11 : f32 to vector<128x128xf32>
    %24 = arith.mulf %23, %22 : vector<128x128xf32>
    %c0_12 = arith.constant 0 : index
    %c0_13 = arith.constant 0 : index
    %c0_14 = arith.constant 0 : index
    %25 = vector.load %arg6[%c0_12, %c0_13, %c0_14] : memref<1x128x128xf32, #tpu.memory_space<vmem>>, vector<1x128x128xf32>
    %26 = vector.shape_cast %25 : vector<1x128x128xf32> to vector<128x128xf32>
    %27 = vector.shape_cast %24 : vector<128x128xf32> to vector<1x128x128xf32>
    tpu.vector_store %arg6[%c0_12, %c0_13, %c0_14], %27 {strides = array<i32>} : memref<1x128x128xf32, #tpu.memory_space<vmem>>, vector<1x128x128xf32>,
    return
  }
  func.func @transform_0(%arg0: i32, %arg1: i32) -> (i32, i32, i32) {
    %c0_i32 = arith.constant 0 : i32
    %c0_i32_0 = arith.constant 0 : i32
    return %arg0, %c0_i32, %arg1 : i32, i32, i32
  }
  func.func @transform_1(%arg0: i32, %arg1: i32) -> (i32, i32, i32) {
    %c1_i32 = arith.constant 1 : i32
    %0 = arith.addi %arg1, %c1_i32 : i32
    %c1_i32_0 = arith.constant 1 : i32
    %1 = arith.muli %0, %c1_i32_0 : i32
    %c0_i32 = arith.constant 0 : i32
    %c0_i32_1 = arith.constant 0 : i32
    return %arg0, %c0_i32, %1 : i32, i32, i32
  }
  func.func @transform_2(%arg0: i32, %arg1: i32) -> (i32, i32) {
    %c0_i32 = arith.constant 0 : i32
    %c0_i32_0 = arith.constant 0 : i32
    %c0_i32_1 = arith.constant 0 : i32
    return %c0_i32, %c0_i32_0 : i32, i32
  }
  func.func @transform_3(%arg0: i32, %arg1: i32) -> (i32, i32) {
    %c0_i32 = arith.constant 0 : i32
    %c0_i32_0 = arith.constant 0 : i32
    %c0_i32_1 = arith.constant 0 : i32
    return %c0_i32, %c0_i32_0 : i32, i32
  }
  func.func @transform_4(%arg0: i32, %arg1: i32) -> (i32, i32, i32) {
    %c0_i32 = arith.constant 0 : i32
    %c0_i32_0 = arith.constant 0 : i32
    return %arg0, %c0_i32, %arg1 : i32, i32, i32
  }
}

</mosaic_0001>

<bundles_post_ra>
// kernel: mel_spec_gpu.1
= control target key start
LH: loop header
LB: loop body
LE: loop exit
PB: predicated region body
PF: predicated region fallthrough
CT: control target
= control target key end

     0   :  { %s1739_s15 = smov 0   ;;  %s1741_s16 = smov 0   ;;  %s1996_s0 = inlined_call_operand.vmem [shape: bf16[2,64,256], index: 0, kind: input, shape index: {}, may-alias: {0,1}]   ;;  %s1997_s1 = inlined_call_operand.vmem [shape: bf16[2,64,256], index: 1, kind: input, shape index: {}, may-alias: {0,1}]   ;;  %s1998_s2 = inlined_call_operand.vmem [shape: bf16[256,256], index: 2, kind: input, shape index: {}]   ;;  %s1999_s3 = inlined_call_operand.vmem [shape: bf16[128,128], index: 3, kind: input, shape index: {}]   ;;  %s2000_s4 = inlined_call_operand.vmem [shape: f32[2,128,128], index: 4, kind: output, shape index: {}]  }
   0x1   :  { %s1743_s17 = smov 0   ;;  %s1745_s18 = smov 0  }
   0x2   :  { %s1747_s19 = smov 0  }
   0x3 LB: > { %s26_s20 = sadd.s32 1, %s1705_s18  ;;  %p42_p1 = scmp.ne.s32.totalorder %s1697_s16, %s1693_s15  ;;  %s1709_s19 = sphi %s1747_s19, %s14_s19   ;;  %s1705_s18 = sphi %s1745_s18, %s2005_s18   ;;  %s1701_s17 = sphi %s1743_s17, %s2004_s17   ;;  %s1697_s16 = sphi %s1741_s16, %s2003_s16   ;;  %s1693_s15 = sphi %s1739_s15, %s2002_s15  }
   0x4   : > { %p28_p0 = scmp.ge.s32.totalorder %s26_s20, 2  ;;  %p43_p2 = scmp.eq.s32.totalorder %s1709_s19, 0 }
   0x5   : > { %s35_s23 = sadd.s32 1, %s1697_s16  ;;  %p1283_p5 = scmp.ge.s32.totalorder %s1709_s19, 2 }
   0x6   : > { %s2007_s20 = smov (%p28_p0, %s26_s20), 0  ;;  %p1770_p3 = por %p43_p2, %p42_p1 }
   0x7   : > { %s30_s22 = ssub.s32 %s1705_s18, %s2007_s20  ;;  %174 = sbr.rel (%p1283_p5) target bundleno = 32 (0x20), region = 24 }
   0x8   : > { %p33_p4 = scmp.eq.s32.totalorder %s30_s22, 0 }
   0xa   : > { %s1778_s24 = scalar_select %p33_p4, %s1697_s16, %s35_s23  }
   0xe   : > { %177 = sbr.rel (!%p1770_p3) target bundleno = 23 (0x17), region = 28  ;;  %s179_s25 = sand.u32 (%p1770_p3), 1, %s1697_s16  }
   0xf   : > { %s1353_s26 = sshll.u32 (%p1770_p3), %s1705_s18, 6  ;;  %s1284_s27 = sshll.u32 (%p1770_p3), %s179_s25, 5 }
  0x10   : > { %s185_s30 = scalar_lea.vmem (%p1770_p3), %s1996_s0, %s1353_s26  ;;  %s181_s5 = scalar_lea.vmem (%p1770_p3), [#allocation2], %s1284_s27 }
  0x11   : > { %v201_v0 = vld [vmem:[%s185_s30] sm:$0xf] (%p1770_p3)  ;;  %v203_v1 = vld [vmem:[%s185_s30 + $0x8] sm:$0xf] (%p1770_p3)  ;;  %v205_v2 = vld [vmem:[%s185_s30 + $0x10] sm:$0xf] (%p1770_p3) }
  0x12   : > { %202 = vst [vmem:[%s181_s5] sm:$0xf] (%p1770_p3), %v201_v0  ;;  %204 = vst [vmem:[%s181_s5 + $0x4] sm:$0xf] (%p1770_p3), %v203_v1  ;;  %v207_v3 = vld [vmem:[%s185_s30 + $0x18] sm:$0xf] (%p1770_p3) }
  0x13   : > { %v209_v4 = vld [vmem:[%s185_s30 + $0x20] sm:$0xf] (%p1770_p3)  ;;  %206 = vst [vmem:[%s181_s5 + $0x8] sm:$0xf] (%p1770_p3), %v205_v2  ;;  %208 = vst [vmem:[%s181_s5 + $0xc] sm:$0xf] (%p1770_p3), %v207_v3 }
  0x14   : > { %210 = vst [vmem:[%s181_s5 + $0x10] sm:$0xf] (%p1770_p3), %v209_v4  ;;  %v211_v5 = vld [vmem:[%s185_s30 + $0x28] sm:$0xf] (%p1770_p3)  ;;  %v213_v6 = vld [vmem:[%s185_s30 + $0x30] sm:$0xf] (%p1770_p3) }
  0x15   : > { %v215_v7 = vld [vmem:[%s185_s30 + $0x38] sm:$0xf]  ;;  %212 = vst [vmem:[%s181_s5 + $0x14] sm:$0xf] %v211_v5  ;;  %214 = vst [vmem:[%s181_s5 + $0x18] sm:$0xf] %v213_v6 }
  0x16   : > { %216 = vst [vmem:[%s181_s5 + $0x1c] sm:$0xf] %v215_v7 }
  0x17 PF: > { %255 = sbr.rel (!%p1770_p3) target bundleno = 32 (0x20), region = 69  ;;  %s257_s6 = sand.u32 (%p1770_p3), 1, %s1697_s16  }
  0x18   : > { %s1354_s7 = sshll.u32 (%p1770_p3), %s1705_s18, 6  ;;  %s1287_s8 = sshll.u32 (%p1770_p3), %s257_s6, 5 }
  0x19   : > { %s1212_s11 = scalar_lea.vmem (%p1770_p3), %s1997_s1, %s1354_s7  ;;  %s259_s12 = scalar_lea.vmem (%p1770_p3), [#allocation3], %s1287_s8 }
  0x1a   : > { %v1290_v8 = vld [vmem:[%s1212_s11 + $0x4] sm:$0xf] (%p1770_p3)  ;;  %v1291_v9 = vld [vmem:[%s1212_s11 + $0xc] sm:$0xf] (%p1770_p3)  ;;  %v1292_v10 = vld [vmem:[%s1212_s11 + $0x14] sm:$0xf] (%p1770_p3) }
  0x1b   : > { %281 = vst [vmem:[%s259_s12] sm:$0xf] (%p1770_p3), %v1290_v8  ;;  %283 = vst [vmem:[%s259_s12 + $0x4] sm:$0xf] (%p1770_p3), %v1291_v9  ;;  %v1293_v11 = vld [vmem:[%s1212_s11 + $0x1c] sm:$0xf] (%p1770_p3) }
  0x1c   : > { %v1294_v12 = vld [vmem:[%s1212_s11 + $0x24] sm:$0xf] (%p1770_p3)  ;;  %285 = vst [vmem:[%s259_s12 + $0x8] sm:$0xf] (%p1770_p3), %v1292_v10  ;;  %287 = vst [vmem:[%s259_s12 + $0xc] sm:$0xf] (%p1770_p3), %v1293_v11 }
  0x1d   : > { %289 = vst [vmem:[%s259_s12 + $0x10] sm:$0xf] (%p1770_p3), %v1294_v12  ;;  %v1295_v13 = vld [vmem:[%s1212_s11 + $0x2c] sm:$0xf] (%p1770_p3)  ;;  %v1296_v14 = vld [vmem:[%s1212_s11 + $0x34] sm:$0xf] (%p1770_p3) }
  0x1e   : > { %v1297_v15 = vld [vmem:[%s1212_s11 + $0x3c] sm:$0xf]  ;;  %291 = vst [vmem:[%s259_s12 + $0x14] sm:$0xf] %v1295_v13  ;;  %293 = vst [vmem:[%s259_s12 + $0x18] sm:$0xf] %v1296_v14 }
  0x1f   : > { %295 = vst [vmem:[%s259_s12 + $0x1c] sm:$0xf] %v1297_v15 }
  0x20 PF: > { %p1298_p6 = scmp.ge.s32.totalorder %s1709_s19, 1  ;;  %p333_p7 = scmp.lt.s32.totalorder %s1709_s19, 3 }
  0x22   : > { %p334_p8 = pnand %p1298_p6, %p333_p7 }
  0x23   : > { %s340_s13 = sand.u32 (!%p334_p8), 1, %s1693_s15   ;;  %s1711_s22 = smov (!%p334_p8), 126   ;;  %v1585_v24 = vld [vmem:[%s1998_s2 + $0x4] ss:$8 sps:$4 sm:$0xff] (!%p334_p8)   ;;  %vm490_vm0 = vcmask (!%p334_p8), 1031168   ;;  %vm515_vm1 = vcmask (!%p334_p8), 1022976  }
  0x24   : > { %337 = sbr.rel (%p334_p8) target bundleno = 783 (0x30f), region = 110  ;;  %s1299_s14 = sshll.u32 (!%p334_p8), %s340_s13, 5  ;;  %748 = vmatprep.mubr.bf16.mxu0 (!%p334_p8), %v1585_v24  ;;  %v1593_v25 = vld [vmem:[%s1998_s2 + $0xa4] ss:$8 sps:$4 sm:$0xff] (!%p334_p8)   ;;  %vm465_vm2 = vcmask (!%p334_p8), 1039360  }
  0x25   : > { %s342_s21 = scalar_lea.vmem (!%p334_p8), [#allocation2], %s1299_s14  ;;  %s349_s23 = scalar_lea.vmem (!%p334_p8), [#allocation3], %s1299_s14  ;;  %828 = vmatprep.mubr.bf16.mxu1 (!%p334_p8), %v1593_v25  ;;  %v1583_v62 = vld [vmem:[%s1998_s2] ss:$8 sps:$4 sm:$0xff] (!%p334_p8)   ;;  %v1586_v0 = vld [vmem:[%s1998_s2 + $0x14] ss:$8 sps:$4 sm:$0xff] (!%p334_p8)  }
  0x26   : > { %v1575_v16 = vld [vmem:[%s342_s21 + $0x8] sm:$0xff] (!%p334_p8)   ;;  %v1576_v17 = vld [vmem:[%s342_s21] sm:$0xff] (!%p334_p8)   ;;  %v1579_v20 = vld [vmem:[%s349_s23 + $0x10] sm:$0xff] (!%p334_p8)   ;;  %s1712_s15 = smov (!%p334_p8), 125   ;;  %s1713_s25 = smov (!%p334_p8), 127  }
  0x27   : > { %478 = vrot.lane.b32.xlu1 (!%p334_p8), %v1575_v16, %s1711_s22  ;;  %v1577_v18 = vld [vmem:[%s349_s23 + $0x8] sm:$0xff] (!%p334_p8)   ;;  %474 = vrot.lane.b32.xlu0 (!%p334_p8), %v1576_v17, %s1711_s22  ;;  %v1578_v19 = vld [vmem:[%s349_s23] sm:$0xff] (!%p334_p8)   ;;  %p380_p9 = scmp.lt.s32.totalorder (!%p334_p8), %s1701_s17, 1 }
  0x28   : > { %v1580_v21 = vld [vmem:[%s342_s21 + $0x10] sm:$0xff] (!%p334_p8)   ;;  %v1581_v22 = vld [vmem:[%s349_s23 + $0x18] sm:$0xff] (!%p334_p8)   ;;  %v1591_v63 = vld [vmem:[%s1998_s2 + $0xa0] ss:$8 sps:$4 sm:$0xff] (!%p334_p8)  }
  0x29   : > { %v1582_v23 = vld [vmem:[%s342_s21 + $0x18] sm:$0xff] (!%p334_p8)   ;;  %v1589_v4 = vld [vmem:[%s1998_s2 + $0x24] ss:$8 sps:$4 sm:$0xff] (!%p334_p8)   ;;  %v1594_v6 = vld [vmem:[%s1998_s2 + $0x20] ss:$8 sps:$4 sm:$0xff] (!%p334_p8)  }
  0x2a   : > { %v1597_v1 = vld [vmem:[%s1998_s2 + $0xb4] ss:$8 sps:$4 sm:$0xff] (!%p334_p8)   ;;  %v1588_v2 = vld [vmem:[%s1998_s2 + $0x10] ss:$8 sps:$4 sm:$0xff] (!%p334_p8)   ;;  %v1603_v5 = vld [vmem:[%s1998_s2 + $0xc4] ss:$8 sps:$4 sm:$0xff] (!%p334_p8)  }
  0x2b   : > { %480 = vrot.lane.b32.xlu1 %v1577_v18, %s1711_s22  ;;  %476 = vrot.lane.b32.xlu0 %v1578_v19, %s1711_s22  ;;  %v1600_v3 = vld [vmem:[%s1998_s2 + $0xb0] ss:$8 sps:$4 sm:$0xff]   ;;  %v1606_v7 = vld [vmem:[%s1998_s2 + $0xc0] ss:$8 sps:$4 sm:$0xff]   ;;  %s2009_s17 = smov (!%p380_p9, %s1701_s17), 1 }
  0x2c   : > { %v1595_v8 = vld [vmem:[%s1998_s2 + $0x34] ss:$8 sps:$4 sm:$0xff]   ;;  %v1599_v10 = vld [vmem:[%s1998_s2 + $0x30] ss:$8 sps:$4 sm:$0xff]   ;;  %v1601_v12 = vld [vmem:[%s1998_s2 + $0x44] ss:$8 sps:$4 sm:$0xff]  }
  0x2d   : > { %v1609_v9 = vld [vmem:[%s1998_s2 + $0xd4] ss:$8 sps:$4 sm:$0xff]   ;;  %v1612_v11 = vld [vmem:[%s1998_s2 + $0xd0] ss:$8 sps:$4 sm:$0xff]   ;;  %v1615_v13 = vld [vmem:[%s1998_s2 + $0xe4] ss:$8 sps:$4 sm:$0xff]  }
  0x2e   : > { %v1605_v14 = vld [vmem:[%s1998_s2 + $0x40] ss:$8 sps:$4 sm:$0xff]   ;;  %v1625_v24 = vld [vmem:[%s1998_s2 + $0x84] ss:$8 sps:$4 sm:$0xff]   ;;  %s1355_s26 = sshll.u32 %s2009_s17, 7 }
  0x2f   : > { %484 = vrot.lane.b32.xlu1 %v1579_v20, %s1711_s22  ;;  %482 = vrot.lane.b32.xlu0 %v1580_v21, %s1711_s22  ;;  %v1618_v15 = vld [vmem:[%s1998_s2 + $0xe0] ss:$8 sps:$4 sm:$0xff]   ;;  %s1963_s29 = scalar_lea.vmem %s2000_s4, %s1355_s26 }
  0x30   : > { %v1627_v25 = vld [vmem:[%s1998_s2 + $0x80] ss:$8 sps:$4 sm:$0xff]  }
  0x33   : > { %488 = vrot.lane.b32.xlu1 %v1581_v22, %s1711_s22  ;;  %486 = vrot.lane.b32.xlu0 %v1582_v23, %s1711_s22 }
  0x37   : > { %501 = vrot.lane.b32.xlu1 %v1578_v19, %s1712_s15  ;;  %499 = vrot.lane.b32.xlu0 %v1576_v17, %s1712_s15 }
  0x3b   : > { %451 = vrot.lane.b32.xlu1 %v1578_v19, %s1713_s25  ;;  %449 = vrot.lane.b32.xlu0 %v1576_v17, %s1713_s25  ;;  %v1624_v19 = vld [vmem:[%s1998_s2 + $0xf0] ss:$8 sps:$4 sm:$0xff]  }
  0x3f   : > { %505 = vrot.lane.b32.xlu1 %v1577_v18, %s1712_s15  ;;  %503 = vrot.lane.b32.xlu0 %v1575_v16, %s1712_s15 }
  0x43   : > { %455 = vrot.lane.b32.xlu1 %v1577_v18, %s1713_s25  ;;  %453 = vrot.lane.b32.xlu0 %v1575_v16, %s1713_s25  ;;  %v1611_v18 = vld [vmem:[%s1998_s2 + $0x50] ss:$8 sps:$4 sm:$0xff]  }
  0x47   : > { %509 = vrot.lane.b32.xlu1 %v1579_v20, %s1712_s15  ;;  %507 = vrot.lane.b32.xlu0 %v1580_v21, %s1712_s15 }
  0x4b   : > { %459 = vrot.lane.b32.xlu1 %v1579_v20, %s1713_s25  ;;  %457 = vrot.lane.b32.xlu0 %v1580_v21, %s1713_s25  ;;  %v1613_v20 = vld [vmem:[%s1998_s2 + $0x64] ss:$8 sps:$4 sm:$0xff]  }
  0x4f   : > { %513 = vrot.lane.b32.xlu1 %v1581_v22, %s1712_s15  ;;  %511 = vrot.lane.b32.xlu0 %v1582_v23, %s1712_s15 }
  0x53   : > { %463 = vrot.lane.b32.xlu1 %v1581_v22, %s1713_s25  ;;  %461 = vrot.lane.b32.xlu0 %v1582_v23, %s1713_s25  ;;  %v1619_v22 = vld [vmem:[%s1998_s2 + $0x74] ss:$8 sps:$4 sm:$0xff]  }
  0x99   : > { %v479_v26 = vpop.permute.xlu1 %478  ;;  %v475_v27 = vpop.permute.xlu0 %474 }
  0x9d   : > { %v481_v28 = vpop.permute.xlu1 %480  ;;  %v477_v29 = vpop.permute.xlu0 %476 }
  0x9e   : > { %v491_v30 = vsel %vm490_vm0, %v475_v27, %v477_v29  ;;  %v492_v32 = vsel %vm490_vm0, %v479_v26, %v481_v28  ;;  %v1628_v26 = vld [vmem:[%s1998_s2 + $0x94] ss:$8 sps:$4 sm:$0xff]   ;;  %v1630_v27 = vld [vmem:[%s1998_s2 + $0x90] ss:$8 sps:$4 sm:$0xff]   ;;  %v1631_v28 = vld [vmem:[%s1999_s3] sm:$0xff]  }
  0x9f   : > { %1356 = vmatprep.subr.bf16.mxu0 %v491_v30  ;;  %1516 = vmatprep.subr.bf16.mxu1 %v491_v30 }
  0xa0   : > { %1357 = vmatpush3.bf16.msra.mxu0 %v1576_v17  ;;  %1524 = vmatpush3.bf16.msra.mxu1 %v1576_v17  ;;  %v1621_v17 = vld [vmem:[%s1998_s2 + $0xf4] ss:$8 sps:$4 sm:$0xff]  }
  0xa1   : > { %v485_v31 = vpop.permute.xlu1 %484  ;;  %1358 = vmatprep.subr.bf16.mxu0 %v492_v32  ;;  %1517 = vmatprep.subr.bf16.mxu1 %v492_v32  ;;  %v483_v33 = vpop.permute.xlu0 %482 }
  0xa2   : > { %v493_v35 = vsel %vm490_vm0, %v483_v33, %v485_v31 }
  0xa4   : > { %1359 = vmatpush3.bf16.msra.mxu0 %v1575_v16  ;;  %1525 = vmatpush3.bf16.msra.mxu1 %v1575_v16  ;;  %v1607_v16 = vld [vmem:[%s1998_s2 + $0x54] ss:$8 sps:$4 sm:$0xff]  }
  0xa5   : > { %v489_v34 = vpop.permute.xlu1 %488  ;;  %1360 = vmatprep.subr.bf16.mxu0 %v493_v35  ;;  %1518 = vmatprep.subr.bf16.mxu1 %v493_v35  ;;  %v487_v36 = vpop.permute.xlu0 %486 }
  0xa6   : > { %v494_v38 = vsel %vm490_vm0, %v487_v36, %v489_v34 }
  0xa8   : > { %1361 = vmatpush3.bf16.msra.mxu0 %v1580_v21  ;;  %1526 = vmatpush3.bf16.msra.mxu1 %v1580_v21  ;;  %v1617_v21 = vld [vmem:[%s1998_s2 + $0x60] ss:$8 sps:$4 sm:$0xff]  }
  0xa9   : > { %v502_v37 = vpop.permute.xlu1 %501  ;;  %1362 = vmatprep.subr.bf16.mxu0 %v494_v38  ;;  %1519 = vmatprep.subr.bf16.mxu1 %v494_v38  ;;  %v500_v39 = vpop.permute.xlu0 %499 }
  0xaa   : > { %v516_v41 = vsel %vm515_vm1, %v500_v39, %v502_v37 }
  0xac   : > { %1363 = vmatpush3.bf16.msra.mxu0 %v1582_v23  ;;  %1527 = vmatpush3.bf16.msra.mxu1 %v1582_v23  ;;  %v1623_v23 = vld [vmem:[%s1998_s2 + $0x70] ss:$8 sps:$4 sm:$0xff]  }
  0xad   : > { %v452_v40 = vpop.permute.xlu1 %451  ;;  %1364 = vmatprep.subr.bf16.mxu0 %v516_v41  ;;  %1520 = vmatprep.subr.bf16.mxu1 %v516_v41  ;;  %v450_v42 = vpop.permute.xlu0 %449 }
  0xae   : > { %v466_v43 = vsel %vm465_vm2, %v450_v42, %v452_v40 }
  0xb0   : > { %1365 = vmatpush3.bf16.msra.mxu0 %v466_v43  ;;  %1528 = vmatpush3.bf16.msra.mxu1 %v466_v43 }
  0xb1   : > { %v506_v44 = vpop.permute.xlu1 %505  ;;  %v504_v45 = vpop.permute.xlu0 %503 }
  0xb2   : > { %v517_v46 = vsel %vm515_vm1, %v504_v45, %v506_v44 }
  0xb3   : > { %1366 = vmatprep.subr.bf16.mxu0 %v517_v46  ;;  %1521 = vmatprep.subr.bf16.mxu1 %v517_v46 }
  0xb5   : > { %v456_v47 = vpop.permute.xlu1 %455  ;;  %v454_v48 = vpop.permute.xlu0 %453 }
  0xb6   : > { %v467_v49 = vsel %vm465_vm2, %v454_v48, %v456_v47 }
  0xb7   : > { %1367 = vmatpush3.bf16.msra.mxu0 %v467_v49  ;;  %1529 = vmatpush3.bf16.msra.mxu1 %v467_v49 }
  0xb9   : > { %v510_v50 = vpop.permute.xlu1 %509  ;;  %v508_v51 = vpop.permute.xlu0 %507 }
  0xba   : > { %v518_v52 = vsel %vm515_vm1, %v508_v51, %v510_v50 }
  0xbb   : > { %1368 = vmatprep.subr.bf16.mxu0 %v518_v52  ;;  %1522 = vmatprep.subr.bf16.mxu1 %v518_v52 }
  0xbd   : > { %v460_v53 = vpop.permute.xlu1 %459  ;;  %v458_v54 = vpop.permute.xlu0 %457 }
  0xbe   : > { %v468_v55 = vsel %vm465_vm2, %v458_v54, %v460_v53 }
  0xbf   : > { %1369 = vmatpush3.bf16.msra.mxu0 %v468_v55  ;;  %1530 = vmatpush3.bf16.msra.mxu1 %v468_v55 }
  0xc1   : > { %v514_v56 = vpop.permute.xlu1 %513  ;;  %v512_v57 = vpop.permute.xlu0 %511 }
  0xc2   : > { %v519_v58 = vsel %vm515_vm1, %v512_v57, %v514_v56 }
  0xc3   : > { %1370 = vmatprep.subr.bf16.mxu0 %v519_v58  ;;  %1523 = vmatprep.subr.bf16.mxu1 %v519_v58 }
  0xc5   : > { %v464_v59 = vpop.permute.xlu1 %463  ;;  %v462_v60 = vpop.permute.xlu0 %461 }
  0xc6   : > { %v469_v61 = vsel %vm465_vm2, %v462_v60, %v464_v59 }
  0xc7   : > { %1371 = vmatpush3.bf16.msra.mxu0 %v469_v61  ;;  %1531 = vmatpush3.bf16.msra.mxu1 %v469_v61 }
  0xca   : > { %749 = vmatmul.mubr.bf16.vlgmr.msra.gmra.mrb[0].mxu0 %v1583_v62  ;;  %829 = vmatmul.mubr.bf16.vlgmr.msra.gmra.mrb[0].mxu1 %v1591_v63 }
  0xcb   : > { %756 = vmatprep.mubr.bf16.mxu0 %v1586_v0  ;;  %836 = vmatprep.mubr.bf16.mxu1 %v1597_v1 }
  0xd2   : > { %757 = vmatmul.mubr.bf16.gmra.mrb[4].mxu0 %v1588_v2  ;;  %837 = vmatmul.mubr.bf16.gmra.mrb[4].mxu1 %v1600_v3 }
  0xd3   : > { %764 = vmatprep.mubr.bf16.mxu0 %v1589_v4  ;;  %844 = vmatprep.mubr.bf16.mxu1 %v1603_v5 }
  0xda   : > { %765 = vmatmul.mubr.bf16.gmra.mrb[8].mxu0 %v1594_v6  ;;  %845 = vmatmul.mubr.bf16.gmra.mrb[8].mxu1 %v1606_v7 }
  0xdb   : > { %772 = vmatprep.mubr.bf16.mxu0 %v1595_v8  ;;  %852 = vmatprep.mubr.bf16.mxu1 %v1609_v9 }
  0xe2   : > { %773 = vmatmul.mubr.bf16.gmra.mrb[12].mxu0 %v1599_v10  ;;  %853 = vmatmul.mubr.bf16.gmra.mrb[12].mxu1 %v1612_v11 }
  0xe3   : > { %780 = vmatprep.mubr.bf16.mxu0 %v1601_v12  ;;  %860 = vmatprep.mubr.bf16.mxu1 %v1615_v13 }
  0xea   : > { %781 = vmatmul.mubr.bf16.gmra.mrb[16].mxu0 %v1605_v14  ;;  %861 = vmatmul.mubr.bf16.gmra.mrb[16].mxu1 %v1618_v15 }
  0xeb   : > { %788 = vmatprep.mubr.bf16.mxu0 %v1607_v16  ;;  %868 = vmatprep.mubr.bf16.mxu1 %v1621_v17 }
  0xf2   : > { %789 = vmatmul.mubr.bf16.gmra.mrb[20].mxu0 %v1611_v18  ;;  %869 = vmatmul.mubr.bf16.gmra.mrb[20].mxu1 %v1624_v19 }
  0xf3   : > { %796 = vmatprep.mubr.bf16.mxu0 %v1613_v20  ;;  %1500 = vmatprep.mubr.bf16.mxu1 %v1631_v28 }
  0xfa   : > { %797 = vmatmul.mubr.bf16.gmra.mrb[24].mxu0 %v1617_v21 }
  0xfb   : > { %804 = vmatprep.mubr.bf16.mxu0 %v1619_v22 }
 0x102   : > { %805 = vmatmul.mubr.bf16.gmra.mrb[28].mxu0 %v1623_v23 }
 0x103   : > { %812 = vmatprep.mubr.bf16.mxu0 %v1625_v24 }
 0x10a   : > { %813 = vmatmul.mubr.bf16.gmra.mrb[32].mxu0 %v1627_v25 }
 0x10b   : > { %820 = vmatprep.mubr.bf16.mxu0 %v1628_v26 }
 0x112   : > { %821 = vmatmul.mubr.bf16.gmra.mrb[36].mxu0 %v1630_v27 }
 0x19d   : > { %v1372_v29 = vpop.f32.mrb[0].mxu0  ;;  %v1432_v30 = vpop.f32.mrb[0].mxu1 }
 0x19e   : > { %v1373_v31 = vpop.f32.mrb[1].mxu0  ;;  %v1433_v32 = vpop.f32.mrb[1].mxu1 }
 0x19f   : > { %v1909_v33 = vadd.f32 %v1373_v31, %v1372_v29  ;;  %v1375_v34 = vpop.f32.mrb[2].mxu0  ;;  %v1434_v35 = vadd.f32 %v1433_v32, %v1432_v30  ;;  %v1435_v36 = vpop.f32.mrb[2].mxu1 }
 0x1a0   : > { %v1376_v37 = vpop.f32.mrb[3].mxu0  ;;  %v1436_v38 = vpop.f32.mrb[3].mxu1 }
 0x1a1   : > { %v1911_v39 = vadd.f32 %v1376_v37, %v1375_v34  ;;  %v1437_v40 = vadd.f32 %v1436_v38, %v1435_v36  ;;  %v897_v58 = vmul.f32 %v1434_v35, %v1434_v35 }
 0x1a3   : > { %v898_v2 = vmul.f32 %v1437_v40, %v1437_v40 }
 0x1a5   : > { %v1378_v41 = vpop.f32.mrb[4].mxu0  ;;  %v1438_v42 = vpop.f32.mrb[4].mxu1 }
 0x1a6   : > { %v1379_v43 = vpop.f32.mrb[5].mxu0  ;;  %v1439_v44 = vpop.f32.mrb[5].mxu1 }
 0x1a7   : > { %v1913_v45 = vadd.f32 %v1379_v43, %v1378_v41  ;;  %v1381_v46 = vpop.f32.mrb[6].mxu0  ;;  %v1440_v47 = vadd.f32 %v1439_v44, %v1438_v42  ;;  %v1441_v48 = vpop.f32.mrb[6].mxu1 }
 0x1a8   : > { %v1382_v49 = vpop.f32.mrb[7].mxu0  ;;  %v1442_v50 = vpop.f32.mrb[7].mxu1 }
 0x1a9   : > { %v1915_v51 = vadd.f32 %v1382_v49, %v1381_v46  ;;  %v1443_v52 = vadd.f32 %v1442_v50, %v1441_v48  ;;  %v899_v12 = vmul.f32 %v1440_v47, %v1440_v47 }
 0x1ab   : > { %v900_v21 = vmul.f32 %v1443_v52, %v1443_v52 }
 0x1ad   : > { %v1384_v53 = vpop.f32.mrb[8].mxu0  ;;  %v1444_v54 = vpop.f32.mrb[8].mxu1 }
 0x1ae   : > { %v1385_v55 = vpop.f32.mrb[9].mxu0  ;;  %v1445_v56 = vpop.f32.mrb[9].mxu1 }
 0x1af   : > { %v1386_v57 = vadd.f32 %v1385_v55, %v1384_v53  ;;  %v1387_v59 = vpop.f32.mrb[10].mxu0  ;;  %v1446_v60 = vadd.f32 %v1445_v56, %v1444_v54  ;;  %v1447_v61 = vpop.f32.mrb[10].mxu1 }
 0x1b0   : > { %v1388_v62 = vpop.f32.mrb[11].mxu0  ;;  %v1448_v63 = vpop.f32.mrb[11].mxu1 }
 0x1b1   : > { %v881_v0 = vmul.f32 %v1386_v57, %v1386_v57  ;;  %v1389_v1 = vadd.f32 %v1388_v62, %v1387_v59  ;;  %v1449_v3 = vadd.f32 %v1448_v63, %v1447_v61  ;;  %v901_v31 = vmul.f32 %v1446_v60, %v1446_v60 }
 0x1b3   : > { %v913_v4 = vadd.f32 %v897_v58, %v881_v0  ;;  %v882_v5 = vmul.f32 %v1389_v1, %v1389_v1  ;;  %v902_v42 = vmul.f32 %v1449_v3, %v1449_v3 }
 0x1b5   : > { %v914_v6 = vadd.f32 %v898_v2, %v882_v5  ;;  %v1390_v7 = vpop.f32.mrb[12].mxu0  ;;  %v1450_v8 = vpop.f32.mrb[12].mxu1 }
 0x1b6   : > { %v1391_v9 = vpop.f32.mrb[13].mxu0  ;;  %v1451_v10 = vpop.f32.mrb[13].mxu1 }
 0x1b7   : > { %v1392_v11 = vadd.f32 %v1391_v9, %v1390_v7  ;;  %v1393_v13 = vpop.f32.mrb[14].mxu0  ;;  %v1452_v14 = vadd.f32 %v1451_v10, %v1450_v8  ;;  %v1453_v15 = vpop.f32.mrb[14].mxu1  ;;  %v1917_v16 = vpack.c.bf16 %v914_v6, %v913_v4 }
 0x1b8   : > { %v1394_v17 = vpop.f32.mrb[15].mxu0  ;;  %v1454_v18 = vpop.f32.mrb[15].mxu1 }
 0x1b9   : > { %v883_v19 = vmul.f32 %v1392_v11, %v1392_v11  ;;  %v1395_v20 = vadd.f32 %v1394_v17, %v1393_v13  ;;  %v1455_v22 = vadd.f32 %v1454_v18, %v1453_v15  ;;  %v903_v54 = vmul.f32 %v1452_v14, %v1452_v14 }
 0x1bb   : > { %v915_v23 = vadd.f32 %v899_v12, %v883_v19  ;;  %v884_v24 = vmul.f32 %v1395_v20, %v1395_v20  ;;  %v904_v63 = vmul.f32 %v1455_v22, %v1455_v22 }
 0x1bd   : > { %v916_v25 = vadd.f32 %v900_v21, %v884_v24  ;;  %v1396_v26 = vpop.f32.mrb[16].mxu0  ;;  %v1456_v27 = vpop.f32.mrb[16].mxu1 }
 0x1be   : > { %v1397_v28 = vpop.f32.mrb[17].mxu0  ;;  %v1457_v29 = vpop.f32.mrb[17].mxu1 }
 0x1bf   : > { %v1398_v30 = vadd.f32 %v1397_v28, %v1396_v26  ;;  %v1399_v32 = vpop.f32.mrb[18].mxu0  ;;  %v1458_v34 = vadd.f32 %v1457_v29, %v1456_v27  ;;  %v1459_v35 = vpop.f32.mrb[18].mxu1  ;;  %v1919_v36 = vpack.c.bf16 %v916_v25, %v915_v23 }
 0x1c0   : > { %v1400_v37 = vpop.f32.mrb[19].mxu0  ;;  %v1460_v38 = vpop.f32.mrb[19].mxu1 }
 0x1c1   : > { %v885_v40 = vmul.f32 %v1398_v30, %v1398_v30  ;;  %v1401_v41 = vadd.f32 %v1400_v37, %v1399_v32  ;;  %v1461_v43 = vadd.f32 %v1460_v38, %v1459_v35  ;;  %v905_v7 = vmul.f32 %v1458_v34, %v1458_v34 }
 0x1c3   : > { %v917_v44 = vadd.f32 %v901_v31, %v885_v40  ;;  %v886_v46 = vmul.f32 %v1401_v41, %v1401_v41  ;;  %v906_v13 = vmul.f32 %v1461_v43, %v1461_v43  ;;  %v877_v40 = vmul.f32 %v1909_v33, %v1909_v33 }
 0x1c4   : > { %v878_v43 = vmul.f32 %v1911_v39, %v1911_v39  ;;  %v880_v33 = vmul.f32 %v1915_v51, %v1915_v51  ;;  %v1633_v51 = vld [vmem:[%s1999_s3 + $0x10] sm:$0xff]  }
 0x1c5   : > { %v918_v47 = vadd.f32 %v902_v42, %v886_v46  ;;  %v1402_v48 = vpop.f32.mrb[20].mxu0  ;;  %v1462_v49 = vpop.f32.mrb[20].mxu1 }
 0x1c6   : > { %v1403_v50 = vpop.f32.mrb[21].mxu0  ;;  %v1463_v52 = vpop.f32.mrb[21].mxu1 }
 0x1c7   : > { %v1404_v53 = vadd.f32 %v1403_v50, %v1402_v48  ;;  %v1405_v55 = vpop.f32.mrb[22].mxu0  ;;  %v1464_v56 = vadd.f32 %v1463_v52, %v1462_v49  ;;  %v1465_v57 = vpop.f32.mrb[22].mxu1  ;;  %v1921_v58 = vpack.c.bf16 %v918_v47, %v917_v44 }
 0x1c8   : > { %v1406_v59 = vpop.f32.mrb[23].mxu0  ;;  %v1466_v60 = vpop.f32.mrb[23].mxu1 }
 0x1c9   : > { %v887_v61 = vmul.f32 %v1404_v53, %v1404_v53  ;;  %v1407_v62 = vadd.f32 %v1406_v59, %v1405_v55  ;;  %v1467_v0 = vadd.f32 %v1466_v60, %v1465_v57  ;;  %v907_v21 = vmul.f32 %v1464_v56, %v1464_v56 }
 0x1ca   : > { %v879_v55 = vmul.f32 %v1913_v45, %v1913_v45  ;;  %v1632_v45 = vld [vmem:[%s1999_s3 + $0x8] sm:$0xff]  }
 0x1cb   : > { %v919_v1 = vadd.f32 %v903_v54, %v887_v61  ;;  %v888_v2 = vmul.f32 %v1407_v62, %v1407_v62  ;;  %v908_v27 = vmul.f32 %v1467_v0, %v1467_v0  ;;  %v1637_v62 = vld [vmem:[%s1999_s3 + $0x30] sm:$0xff]  }
 0x1cd   : > { %v920_v3 = vadd.f32 %v904_v63, %v888_v2  ;;  %v1408_v4 = vpop.f32.mrb[24].mxu0  ;;  %v1638_v63 = vld [vmem:[%s1999_s3 + $0x38] sm:$0xff]  }
 0x1ce   : > { %v1409_v5 = vpop.f32.mrb[25].mxu0 }
 0x1cf   : > { %v1410_v6 = vadd.f32 %v1409_v5, %v1408_v4  ;;  %v1411_v8 = vpop.f32.mrb[26].mxu0  ;;  %v930_v9 = vpack.c.bf16 %v920_v3, %v919_v1 }
 0x1d0   : > { %v1412_v10 = vpop.f32.mrb[27].mxu0 }
 0x1d1   : > { %v889_v11 = vmul.f32 %v1410_v6, %v1410_v6  ;;  %v1413_v12 = vadd.f32 %v1412_v10, %v1411_v8 }
 0x1d3   : > { %v921_v14 = vadd.f32 %v905_v7, %v889_v11  ;;  %v890_v15 = vmul.f32 %v1413_v12, %v1413_v12 }
 0x1d5   : > { %v922_v17 = vadd.f32 %v906_v13, %v890_v15  ;;  %v1414_v18 = vpop.f32.mrb[28].mxu0 }
 0x1d6   : > { %v1415_v19 = vpop.f32.mrb[29].mxu0 }
 0x1d7   : > { %v1416_v20 = vadd.f32 %v1415_v19, %v1414_v18  ;;  %v1417_v22 = vpop.f32.mrb[30].mxu0  ;;  %v931_v23 = vpack.c.bf16 %v922_v17, %v921_v14 }
 0x1d8   : > { %v1418_v24 = vpop.f32.mrb[31].mxu0 }
 0x1d9   : > { %v891_v25 = vmul.f32 %v1416_v20, %v1416_v20  ;;  %v1419_v26 = vadd.f32 %v1418_v24, %v1417_v22 }
 0x1db   : > { %v923_v28 = vadd.f32 %v907_v21, %v891_v25  ;;  %v892_v29 = vmul.f32 %v1419_v26, %v1419_v26 }
 0x1dd   : > { %v924_v30 = vadd.f32 %v908_v27, %v892_v29  ;;  %v1420_v31 = vpop.f32.mrb[32].mxu0 }
 0x1de   : > { %v1421_v32 = vpop.f32.mrb[33].mxu0 }
 0x1df   : > { %v1422_v34 = vadd.f32 %v1421_v32, %v1420_v31  ;;  %v1423_v35 = vpop.f32.mrb[34].mxu0  ;;  %v932_v37 = vpack.c.bf16 %v924_v30, %v923_v28 }
 0x1e0   : > { %v1424_v38 = vpop.f32.mrb[35].mxu0 }
 0x1e1   : > { %v893_v41 = vmul.f32 %v1422_v34, %v1422_v34  ;;  %v1425_v42 = vadd.f32 %v1424_v38, %v1423_v35 }
 0x1e3   : > { %v909_v44 = vadd.f32 %v893_v41, %v877_v40  ;;  %v894_v46 = vmul.f32 %v1425_v42, %v1425_v42 }
 0x1e5   : > { %v910_v47 = vadd.f32 %v894_v46, %v878_v43  ;;  %v1426_v48 = vpop.f32.mrb[36].mxu0 }
 0x1e6   : > { %v1427_v49 = vpop.f32.mrb[37].mxu0 }
 0x1e7   : > { %v1428_v50 = vadd.f32 %v1427_v49, %v1426_v48  ;;  %v1429_v52 = vpop.f32.mrb[38].mxu0  ;;  %v925_v53 = vpack.c.bf16 %v910_v47, %v909_v44 }
 0x1e8   : > { %v1430_v54 = vpop.f32.mrb[39].mxu0 }
 0x1e9   : > { %v895_v56 = vmul.f32 %v1428_v50, %v1428_v50  ;;  %v1431_v57 = vadd.f32 %v1430_v54, %v1429_v52  ;;  %1484 = vmatprep.subr.bf16.mxu1 %v925_v53 }
 0x1ea   : > { %1485 = vmatpush3.bf16.msra.mxu1 %v925_v53 }
 0x1eb   : > { %v911_v39 = vadd.f32 %v895_v56, %v879_v55  ;;  %v896_v59 = vmul.f32 %v1431_v57, %v1431_v57 }
 0x1ed   : > { %v912_v60 = vadd.f32 %v896_v59, %v880_v33 }
 0x1ef   : > { %v926_v61 = vpack.c.bf16 %v912_v60, %v911_v39 }
 0x1f1   : > { %1486 = vmatprep.subr.bf16.mxu1 %v926_v61 }
 0x1f2   : > { %1487 = vmatpush3.bf16.msra.mxu1 %v926_v61 }
 0x1f3   : > { %1488 = vmatprep.subr.bf16.mxu1 %v1917_v16 }
 0x1f6   : > { %1489 = vmatpush3.bf16.msra.mxu1 %v1917_v16  ;;  %v1634_v16 = vld [vmem:[%s1999_s3 + $0x18] sm:$0xff]  }
 0x1f7   : > { %1490 = vmatprep.subr.bf16.mxu1 %v1919_v36 }
 0x1fa   : > { %1491 = vmatpush3.bf16.msra.mxu1 %v1919_v36  ;;  %v1635_v36 = vld [vmem:[%s1999_s3 + $0x20] sm:$0xff]  }
 0x1fb   : > { %1492 = vmatprep.subr.bf16.mxu1 %v1921_v58 }
 0x1fe   : > { %1493 = vmatpush3.bf16.msra.mxu1 %v1921_v58  ;;  %v1636_v58 = vld [vmem:[%s1999_s3 + $0x28] sm:$0xff]  }
 0x1ff   : > { %1494 = vmatprep.subr.bf16.mxu1 %v930_v9 }
 0x202   : > { %1495 = vmatpush3.bf16.msra.mxu1 %v930_v9 }
 0x203   : > { %1496 = vmatprep.subr.bf16.mxu1 %v931_v23 }
 0x206   : > { %1497 = vmatpush3.bf16.msra.mxu1 %v931_v23 }
 0x207   : > { %1498 = vmatprep.subr.bf16.mxu1 %v932_v37 }
 0x20a   : > { %1499 = vmatpush3.bf16.msra.mxu1 %v932_v37 }
 0x20d   : > { %1501 = vmatmul.mubr.bf16.vlgmr.msra.gmra.mrb[24].mxu1 %v1632_v45 }
 0x20e   : > { %1504 = vmatprep.mubr.bf16.mxu1 %v1633_v51 }
 0x215   : > { %1505 = vmatmul.mubr.bf16.gmra.mrb[28].mxu1 %v1634_v16 }
 0x216   : > { %1508 = vmatprep.mubr.bf16.mxu1 %v1635_v36 }
 0x21d   : > { %1509 = vmatmul.mubr.bf16.gmra.mrb[32].mxu1 %v1636_v58 }
 0x21e   : > { %1512 = vmatprep.mubr.bf16.mxu1 %v1637_v62 }
 0x225   : > { %1513 = vmatmul.mubr.bf16.gmra.mrb[36].mxu1 %v1638_v63 }
 0x2e0   : > { %v1502_v0 = vpop.f32.mrb[24].mxu1 }
 0x2e1   : > { %v1096_v1 = vmax.f32 %v1502_v0, 1e-10  ;;  %v1031_v2 = vpop.f32.mrb[25].mxu1 }
 0x2e2   : > { %v1094_v3 = vmax.f32 %v1031_v2, 1e-10  ;;  %v1503_v4 = vpop.f32.mrb[26].mxu1 }
 0x2e3   : > { %1639 = vlog2.f32 %v1096_v1  ;;  %v1097_v5 = vmax.f32 %v1503_v4, 1e-10  ;;  %v1034_v6 = vpop.f32.mrb[27].mxu1 }
 0x2e4   : > { %1641 = vlog2.f32 %v1094_v3  ;;  %v1095_v7 = vmax.f32 %v1034_v6, 1e-10 }
 0x2e5   : > { %1643 = vlog2.f32 %v1097_v5 }
 0x2e6   : > { %1645 = vlog2.f32 %v1095_v7 }
 0x2e8   : > { %v1506_v8 = vpop.f32.mrb[28].mxu1 }
 0x2e9   : > { %v1100_v9 = vmax.f32 %v1506_v8, 1e-10  ;;  %v1047_v10 = vpop.f32.mrb[29].mxu1 }
 0x2ea   : > { %v1098_v11 = vmax.f32 %v1047_v10, 1e-10  ;;  %v1507_v12 = vpop.f32.mrb[30].mxu1 }
 0x2eb   : > { %1647 = vlog2.f32 %v1100_v9  ;;  %v1101_v13 = vmax.f32 %v1507_v12, 1e-10  ;;  %v1050_v14 = vpop.f32.mrb[31].mxu1 }
 0x2ec   : > { %1649 = vlog2.f32 %v1098_v11  ;;  %v1099_v15 = vmax.f32 %v1050_v14, 1e-10 }
 0x2ed   : > { %v1640_v17 = vpop.eup %1639  ;;  %1651 = vlog2.f32 %v1101_v13 }
 0x2ee   : > { %v1642_v18 = vpop.eup %1641  ;;  %v1115_v19 = vmul.f32 0.6931472, %v1640_v17  ;;  %1653 = vlog2.f32 %v1099_v15 }
 0x2ef   : > { %v1644_v20 = vpop.eup %1643  ;;  %v1111_v21 = vmul.f32 0.6931472, %v1642_v18 }
 0x2f0   : > { %v1646_v22 = vpop.eup %1645  ;;  %v1144_v23 = vmul.f32 4.3429446, %v1115_v19  ;;  %v1117_v24 = vmul.f32 0.6931472, %v1644_v20  ;;  %v1510_v25 = vpop.f32.mrb[32].mxu1 }
 0x2f1   : > { %v1142_v26 = vmul.f32 4.3429446, %v1111_v21  ;;  %v1113_v27 = vmul.f32 0.6931472, %v1646_v22  ;;  %v1104_v28 = vmax.f32 %v1510_v25, 1e-10 }
 0x2f2   : > { %1160 = vst [vmem:[%s1963_s29 + $0x10] sm:$0xff] %v1144_v23  ;;  %v1145_v29 = vmul.f32 4.3429446, %v1117_v24  ;;  %v1063_v30 = vpop.f32.mrb[33].mxu1 }
 0x2f3   : > { %1158 = vst [vmem:[%s1963_s29] sm:$0xff] %v1142_v26  ;;  %v1143_v31 = vmul.f32 4.3429446, %v1113_v27  ;;  %1655 = vlog2.f32 %v1104_v28  ;;  %v1102_v32 = vmax.f32 %v1063_v30, 1e-10  ;;  %v1511_v34 = vpop.f32.mrb[34].mxu1 }
 0x2f4   : > { %1161 = vst [vmem:[%s1963_s29 + $0x18] sm:$0xff] %v1145_v29  ;;  %v1105_v35 = vmax.f32 %v1511_v34, 1e-10  ;;  %v1066_v37 = vpop.f32.mrb[35].mxu1 }
 0x2f5   : > { %v1648_v38 = vpop.eup %1647  ;;  %1159 = vst [vmem:[%s1963_s29 + $0x8] sm:$0xff] %v1143_v31  ;;  %1657 = vlog2.f32 %v1102_v32  ;;  %v1103_v40 = vmax.f32 %v1066_v37, 1e-10 }
 0x2f6   : > { %v1650_v41 = vpop.eup %1649  ;;  %v1123_v42 = vmul.f32 0.6931472, %v1648_v38  ;;  %1659 = vlog2.f32 %v1105_v35 }
 0x2f7   : > { %v1652_v43 = vpop.eup %1651  ;;  %v1119_v44 = vmul.f32 0.6931472, %v1650_v41  ;;  %1661 = vlog2.f32 %v1103_v40 }
 0x2f8   : > { %v1654_v46 = vpop.eup %1653  ;;  %v1148_v47 = vmul.f32 4.3429446, %v1123_v42  ;;  %v1125_v48 = vmul.f32 0.6931472, %v1652_v43  ;;  %v1514_v49 = vpop.f32.mrb[36].mxu1 }
 0x2f9   : > { %v1146_v50 = vmul.f32 4.3429446, %v1119_v44  ;;  %v1121_v52 = vmul.f32 0.6931472, %v1654_v46  ;;  %v1108_v53 = vmax.f32 %v1514_v49, 1e-10 }
 0x2fa   : > { %1164 = vst [vmem:[%s1963_s29 + $0x30] sm:$0xff] %v1148_v47  ;;  %v1149_v54 = vmul.f32 4.3429446, %v1125_v48  ;;  %v1079_v55 = vpop.f32.mrb[37].mxu1 }
 0x2fb   : > { %1162 = vst [vmem:[%s1963_s29 + $0x20] sm:$0xff] %v1146_v50  ;;  %v1147_v56 = vmul.f32 4.3429446, %v1121_v52  ;;  %1663 = vlog2.f32 %v1108_v53  ;;  %v1106_v57 = vmax.f32 %v1079_v55, 1e-10  ;;  %v1515_v33 = vpop.f32.mrb[38].mxu1 }
 0x2fc   : > { %1165 = vst [vmem:[%s1963_s29 + $0x38] sm:$0xff] %v1149_v54  ;;  %v1109_v39 = vmax.f32 %v1515_v33, 1e-10  ;;  %v1082_v59 = vpop.f32.mrb[39].mxu1 }
 0x2fd   : > { %v1656_v60 = vpop.eup %1655  ;;  %1163 = vst [vmem:[%s1963_s29 + $0x28] sm:$0xff] %v1147_v56  ;;  %1665 = vlog2.f32 %v1106_v57  ;;  %v1107_v61 = vmax.f32 %v1082_v59, 1e-10 }
 0x2fe   : > { %v1131_v45 = vmul.f32 0.6931472, %v1656_v60  ;;  %1667 = vlog2.f32 %v1109_v39 }
 0x2ff   : > { %v1658_v51 = vpop.eup %1657  ;;  %1669 = vlog2.f32 %v1107_v61 }
 0x300   : > { %v1660_v16 = vpop.eup %1659  ;;  %v1152_v36 = vmul.f32 4.3429446, %v1131_v45  ;;  %v1127_v58 = vmul.f32 0.6931472, %v1658_v51 }
 0x301   : > { %v1662_v62 = vpop.eup %1661  ;;  %v1133_v63 = vmul.f32 0.6931472, %v1660_v16 }
 0x302   : > { %1168 = vst [vmem:[%s1963_s29 + $0x50] sm:$0xff] %v1152_v36  ;;  %v1150_v0 = vmul.f32 4.3429446, %v1127_v58  ;;  %v1129_v1 = vmul.f32 0.6931472, %v1662_v62 }
 0x303   : > { %v1153_v2 = vmul.f32 4.3429446, %v1133_v63 }
 0x304   : > { %1166 = vst [vmem:[%s1963_s29 + $0x40] sm:$0xff] %v1150_v0  ;;  %v1151_v3 = vmul.f32 4.3429446, %v1129_v1 }
 0x305   : > { %v1664_v4 = vpop.eup %1663  ;;  %1169 = vst [vmem:[%s1963_s29 + $0x58] sm:$0xff] %v1153_v2 }
 0x306   : > { %1167 = vst [vmem:[%s1963_s29 + $0x48] sm:$0xff] %v1151_v3  ;;  %v1139_v5 = vmul.f32 0.6931472, %v1664_v4 }
 0x307   : > { %v1666_v6 = vpop.eup %1665 }
 0x308   : > { %v1668_v7 = vpop.eup %1667  ;;  %v1156_v8 = vmul.f32 4.3429446, %v1139_v5  ;;  %v1135_v9 = vmul.f32 0.6931472, %v1666_v6 }
 0x309   : > { %v1670_v10 = vpop.eup %1669  ;;  %v1141_v11 = vmul.f32 0.6931472, %v1668_v7 }
 0x30a   : > { %1172 = vst [vmem:[%s1963_s29 + $0x70] sm:$0xff] %v1156_v8  ;;  %v1154_v12 = vmul.f32 4.3429446, %v1135_v9  ;;  %v1137_v13 = vmul.f32 0.6931472, %v1670_v10 }
 0x30b   : > { %v1157_v14 = vmul.f32 4.3429446, %v1141_v11 }
 0x30c   : > { %1170 = vst [vmem:[%s1963_s29 + $0x60] sm:$0xff] %v1154_v12  ;;  %v1155_v15 = vmul.f32 4.3429446, %v1137_v13 }
 0x30d   : > { %1173 = vst [vmem:[%s1963_s29 + $0x78] sm:$0xff] %v1157_v14 }
 0x30e   : > { %1171 = vst [vmem:[%s1963_s29 + $0x68] sm:$0xff] %v1155_v15 }
 0x30f PF: > { %s14_s19 = sadd.s32 1, %s1709_s19   ;;  %s2002_s15 = smov %s1697_s16 }
 0x310   : > { %p11_p10 = scmp.ge.s32.totalorder %s14_s19, 4   ;;  %s2003_s16 = smov %s1778_s24 }
 0x311   : > { %s2004_s17 = smov %s1705_s18  ;;  %s2005_s18 = smov %s2007_s20 }
 0x312   :  { %13 = sbr.rel (!%p11_p10) target bundleno = 3 (0x3), region = 161 }

</bundles_post_ra>
